<compile_context>
chip_gen: v6e
topology: v6e:2x2x1
jax: 0.10.0
libtpu: 0.0.40
codegen_flags: <defaults>
</compile_context>

<pallas_src>
import jax
import jax.numpy as jnp
from jax.experimental import pallas as pl
from jax.experimental.pallas import tpu as pltpu


def _round_up(x, m):
    return ((x + m - 1) // m) * m


_VMEM_BUDGET = 40 * 1024 * 1024   # conservative: v7x has only 64 MiB physical VMEM
_TM_CAP = 2048                    # keep row tiles a sane size


def _pick_tiles(B, rows_per_img, Kp, Ep, out_bytes):
    """Pick (k images per row tile, TE) so the double-buffered set fits VMEM.

    Prefers TE == Ep (patch stream read from HBM exactly once) and an even
    number of row blocks (clean 2-way TensorCore split on v7x).
    """
    def vmem_bytes(TM, TE):
        return (2 * TM * Kp * 2            # patch tile, bf16, double-buffered
                + 2 * Kp * TE * 2          # weight tile, bf16
                + 2 * TM * TE * 4          # pos tile, f32
                + 2 * TM * TE * out_bytes) # output tile

    e_candidates = [Ep] + [t for t in (1024, 512, 256, 128) if t < Ep and Ep % t == 0]
    for TE in e_candidates:
        fitting = [k for k in range(1, B + 1)
                   if B % k == 0
                   and k * rows_per_img <= _TM_CAP
                   and vmem_bytes(k * rows_per_img, TE) <= _VMEM_BUDGET]
        if not fitting:
            continue
        even = [k for k in fitting if (B // k) % 2 == 0]
        return (max(even) if even else max(fitting)), TE
    return 1, (128 if Ep % 128 == 0 else Ep)


def patch_embed_kernel(p_ref, w_ref, pos_ref, out_ref):
    # p_ref:   (TM, Kp) bf16 flattened patches (row 0 of each image is the
    #          all-zero CLS row, so the matmul contributes nothing there)
    # w_ref:   (Kp, TE) bf16 flattened conv weight
    # pos_ref: (TM, TE) f32  per-image positional rows: cls_token+pos[0] in
    #          row 0, pos[i]+conv_b in rows 1..N, zeros in padding rows
    # out_ref: (TM, TE) output dtype
    acc = jnp.dot(p_ref[...], w_ref[...], preferred_element_type=jnp.float32)
    out_ref[...] = (acc + pos_ref[...]).astype(out_ref.dtype)


def patch_embedding(x, conv_w, conv_b, cls_token, positions, patch_size):
    """x: (B, C, H, W) (NCHW, as in PyTorch). Returns (B, N+1, E) in x.dtype."""
    B, C, H, W = x.shape
    P = patch_size
    Hp, Wp = H // P, W // P
    N = Hp * Wp
    E = conv_w.shape[0]
    K = C * P * P
    out_dtype = x.dtype
    out_bytes = jnp.dtype(out_dtype).itemsize

    # --- padded / tiled geometry -----------------------------------------
    Kp = _round_up(K, 128)
    Ep = _round_up(E, 128)
    rows_per_img = _round_up(N + 1, 16)          # CLS row + N patch rows, padded
    k_imgs, TE = _pick_tiles(B, rows_per_img, Kp, Ep, out_bytes)
    TM = k_imgs * rows_per_img
    n_row_blocks = B // k_imgs
    n_e_blocks = Ep // TE

    # --- glue: patches -> (B*rows_per_img, Kp) bf16 ------------------------
    # Cast before the big transpose (halves its bytes); jnp.pad fuses and is a
    # no-op when K is already lane-aligned.  Row 0 of every image is left
    # all-zero: that is the CLS row, produced entirely by the pos table.
    # TODO(synk): stretch goal — extract patches inside the kernel from the raw
    # NCHW input (memory_space=pl.ANY + in-VMEM reorder) to drop this copy.
    patches = (
        x.astype(jnp.bfloat16)
        .reshape(B, C, Hp, P, Wp, P)
        .transpose(0, 2, 4, 1, 3, 5)             # (B, Hp, Wp, C, P, P)
        .reshape(B, N, K)
    )
    patches_p = jnp.pad(patches, ((0, 0), (1, rows_per_img - 1 - N), (0, Kp - K)))
    patches_2d = patches_p.reshape(B * rows_per_img, Kp)

    # --- weight -> (Kp, Ep) bf16; feature order (c, i, j) matches patches ---
    w_flat = conv_w.reshape(E, K).T.astype(jnp.bfloat16)   # (K, E)
    w_p = jnp.pad(w_flat, ((0, Kp - K), (0, Ep - E)))

    # --- positional table with CLS + conv bias folded in (f32, resident) ---
    cls_row = cls_token.reshape(1, E) + positions[0:1, :]           # no conv_b
    patch_pos = positions[1:, :] + conv_b[None, :]
    pos_img = jnp.concatenate([cls_row, patch_pos], axis=0).astype(jnp.float32)
    pos_img = jnp.pad(pos_img, ((0, rows_per_img - (N + 1)), (0, Ep - E)))
    pos_p = jnp.tile(pos_img, (k_imgs, 1))                          # (TM, Ep)

    # --- grid / specs -------------------------------------------------------
    if n_e_blocks == 1:
        # 1-D grid over row blocks: weight + pos blocks are constant, so they
        # are DMA'd once; only patches and output move per step.
        grid = (n_row_blocks,)
        in_specs = [
            pl.BlockSpec((TM, Kp), lambda r: (r, 0)),
            pl.BlockSpec((Kp, TE), lambda r: (0, 0)),
            pl.BlockSpec((TM, TE), lambda r: (0, 0)),
        ]
        out_specs = pl.BlockSpec((TM, TE), lambda r: (r, 0))
        dim_sem = ("parallel",)
    else:
        # Fallback for very large Ep: rows innermost so the (Kp, TE) weight and
        # pos blocks stay resident along the inner axis.
        grid = (n_e_blocks, n_row_blocks)
        in_specs = [
            pl.BlockSpec((TM, Kp), lambda e, r: (r, 0)),
            pl.BlockSpec((Kp, TE), lambda e, r: (0, e)),
            pl.BlockSpec((TM, TE), lambda e, r: (0, e)),
        ]
        out_specs = pl.BlockSpec((TM, TE), lambda e, r: (r, e))
        dim_sem = ("parallel", "parallel")

    out2d = pl.pallas_call(
        patch_embed_kernel,
        out_shape=jax.ShapeDtypeStruct((B * rows_per_img, Ep), out_dtype),
        grid_spec=pltpu.PrefetchScalarGridSpec(
            num_scalar_prefetch=0,
            grid=grid,
            in_specs=in_specs,
            out_specs=out_specs,
        ),
        compiler_params=pltpu.CompilerParams(
            dimension_semantics=dim_sem,
            vmem_limit_bytes=48 * 1024 * 1024,
        ),
    )(patches_2d, w_p, pos_p)

    # CLS is already row 0 of every image: just reshape + slice, no concat.
    return out2d.reshape(B, rows_per_img, Ep)[:, :N + 1, :E]


def patch_embedding_ref(x, conv_w, conv_b, cls_token, positions, patch_size):
    """Pure-JAX f32 reference mirroring the PyTorch forward."""
    B, C, H, W = x.shape
    P = patch_size
    Hp, Wp = H // P, W // P
    N = Hp * Wp
    E = conv_w.shape[0]
    patches = (
        x.reshape(B, C, Hp, P, Wp, P)
        .transpose(0, 2, 4, 1, 3, 5)
        .reshape(B, N, C * P * P)
    )
    proj = patches @ conv_w.reshape(E, -1).T + conv_b     # (B, N, E)
    cls = jnp.broadcast_to(cls_token.reshape(1, 1, E), (B, 1, E))
    return jnp.concatenate([cls, proj], axis=1) + positions[None, :, :]


if __name__ == "__main__":
    # Small shapes consistent with the module:
    # batch=2, in_channels=4, img_size=16, patch_size=8 -> N=4 patches, emb=32
    B, C, IMG, P, E = 2, 4, 16, 8, 32
    N = (IMG // P) ** 2

    key = jax.random.PRNGKey(0)
    kx, kw, kb, kc, kp = jax.random.split(key, 5)

    x = jax.random.normal(kx, (B, C, IMG, IMG), dtype=jnp.float32)
    conv_w = jax.random.normal(kw, (E, C, P, P), dtype=jnp.float32) * 0.02
    conv_b = jax.random.normal(kb, (E,), dtype=jnp.float32) * 0.02
    cls_token = jax.random.normal(kc, (1, 1, E), dtype=jnp.float32)
    positions = jax.random.normal(kp, (N + 1, E), dtype=jnp.float32)

    out = patch_embedding(x, conv_w, conv_b, cls_token, positions, P)
    out = jax.block_until_ready(out)

    ref = patch_embedding_ref(x, conv_w, conv_b, cls_token, positions, P)
    assert out.shape == (B, N + 1, E), out.shape
    # bf16 MXU path with f32 accumulation: loose tolerance vs the f32 reference.
    assert jnp.allclose(out, ref, atol=2e-2, rtol=2e-2), "mismatch vs reference"

    print("KERNEL_OK")
</pallas_src>

<mosaic_0001>
module attributes {stable_mosaic.version = 11 : i64} {
  func.func @patch_embed_kernel(%arg0: i32, %arg1: memref<16x256xbf16, #tpu.memory_space<vmem>>, %arg2: memref<256x128xbf16, #tpu.memory_space<vmem>>, %arg3: memref<16x128xf32, #tpu.memory_space<vmem>>, %arg4: memref<16x128xf32, #tpu.memory_space<vmem>>) attributes {dimension_semantics = [#tpu.dimension_semantics<parallel>], iteration_bounds = array<i64: 2>, scalar_prefetch = 0 : i64, scratch_operands = 0 : i64, tpu.core_type = #tpu.core_type<tc>, window_params = [{transform_indices = @transform_0, window_bounds = array<i64: 16, 256>}, {pipeline_mode = #tpu.pipeline_mode<synchronous>, transform_indices = @transform_1, window_bounds = array<i64: 256, 128>}, {pipeline_mode = #tpu.pipeline_mode<synchronous>, transform_indices = @transform_2, window_bounds = array<i64: 16, 128>}, {transform_indices = @transform_3, window_bounds = array<i64: 16, 128>}]} {
    %c0 = arith.constant 0 : index
    %c0_0 = arith.constant 0 : index
    %0 = vector.load %arg1[%c0, %c0_0] : memref<16x256xbf16, #tpu.memory_space<vmem>>, vector<16x256xbf16>
    %c0_1 = arith.constant 0 : index
    %c0_2 = arith.constant 0 : index
    %1 = vector.load %arg2[%c0_1, %c0_2] : memref<256x128xbf16, #tpu.memory_space<vmem>>, vector<256x128xbf16>
    %cst = arith.constant dense<0.000000e+00> : vector<16x128xf32>
    %2 = tpu.matmul %0, %1, %cst {dimension_numbers = #tpu.dot_dimension_numbers<[1], [0], [0], [1], [0, 0, 1, 1], [], []>} : vector<16x256xbf16>, vector<256x128xbf16>, vector<16x128xf32> -> vector<16x128xf32>
    %c0_3 = arith.constant 0 : index
    %c0_4 = arith.constant 0 : index
    %3 = vector.load %arg3[%c0_3, %c0_4] : memref<16x128xf32, #tpu.memory_space<vmem>>, vector<16x128xf32>
    %4 = arith.addf %2, %3 : vector<16x128xf32>
    %c0_5 = arith.constant 0 : index
    %c0_6 = arith.constant 0 : index
    %5 = vector.load %arg4[%c0_5, %c0_6] : memref<16x128xf32, #tpu.memory_space<vmem>>, vector<16x128xf32>
    tpu.vector_store %arg4[%c0_5, %c0_6], %4 {strides = array<i32>} : memref<16x128xf32, #tpu.memory_space<vmem>>, vector<16x128xf32>,
    return
  }
  func.func @transform_0(%arg0: i32) -> (i32, i32) {
    %c0_i32 = arith.constant 0 : i32
    %c0_i32_0 = arith.constant 0 : i32
    return %arg0, %c0_i32 : i32, i32
  }
  func.func @transform_1(%arg0: i32) -> (i32, i32) {
    %c0_i32 = arith.constant 0 : i32
    %c0_i32_0 = arith.constant 0 : i32
    %c0_i32_1 = arith.constant 0 : i32
    return %c0_i32, %c0_i32_0 : i32, i32
  }
  func.func @transform_2(%arg0: i32) -> (i32, i32) {
    %c0_i32 = arith.constant 0 : i32
    %c0_i32_0 = arith.constant 0 : i32
    %c0_i32_1 = arith.constant 0 : i32
    return %c0_i32, %c0_i32_0 : i32, i32
  }
  func.func @transform_3(%arg0: i32) -> (i32, i32) {
    %c0_i32 = arith.constant 0 : i32
    %c0_i32_0 = arith.constant 0 : i32
    return %arg0, %c0_i32 : i32, i32
  }
}

</mosaic_0001>

<bundles_post_ra>
// kernel: tpu_custom_call.1
= control target key start
LH: loop header
LB: loop body
LE: loop exit
PB: predicated region body
PF: predicated region fallthrough
CT: control target
= control target key end

     0   :  { %8 = vsyncpa [#allocation3], 0  ;;  %s1049_s0 = inlined_call_operand.hbm [shape: bf16[32,256], index: 0, kind: input, shape index: {}]   ;;  %s1050_s1 = inlined_call_operand.hbm [shape: bf16[256,128], index: 1, kind: input, shape index: {}]   ;;  %s1051_s2 = inlined_call_operand.hbm [shape: f32[16,128], index: 2, kind: input, shape index: {}]   ;;  %s1052_s3 = inlined_call_operand.hbm [shape: f32[32,128], index: 3, kind: output, shape index: {}]  }
   0x1   :  { %10 = vsyncpa [#allocation3 + $0x1], 0 }
   0x2   :  { %11 = vsyncpa [#allocation6], 0 }
   0x3   :  { %12 = vsyncpa [#allocation4], 0 }
   0x4   :  { %14 = vsyncpa [#allocation4 + $0x1], 0  ;;  %s847_s12 = smov 0   ;;  %s849_s13 = smov 0  }
   0x5   :  { %s851_s14 = smov 0   ;;  %s853_s15 = smov 0  }
   0x6 LB: > { %s868_s16 = sadd.s32 4294967295, %s815_s15   ;;  %s513_s17 = sadd.s32 4294967294, %s815_s15   ;;  %s815_s15 = sphi %s853_s15, %s1074_s15   ;;  %s811_s14 = sphi %s851_s14, %s1073_s14   ;;  %s807_s13 = sphi %s849_s13, %s1072_s13   ;;  %s803_s12 = sphi %s847_s12, %s1071_s12  }
   0x7   : > { %p40_p0 = scmp.ne.s32.totalorder %s807_s13, %s803_s12  ;;  %p1053_p1 = scmp.eq.s32.totalorder %s868_s16, 0 }
   0x8   : > { %p112_p3 = scmp.eq.s32.totalorder %s513_s17, 1  ;;  %p514_p5 = scmp.ge.s32.totalorder %s815_s15, 1 }
   0x9   : > { %p877_p4 = por %p1053_p1, %p40_p0  ;;  %p119_p7 = scmp.lt.s32.totalorder %s815_s15, 3 }
   0xa   : > { %p882_p6 = por %p112_p3, %p40_p0  ;;  %s817_s21 = smov [#allocation5]  }
   0xb   : > { %s1057_s18 = scalar_select %p877_p4, 1, 0 }
   0xc   : > { %s1058_s19 = scalar_select %p882_p6, 1, 0 }
   0xd   : > { %p887_p8 = pnand %p514_p5, %p119_p7  ;;  %s131_s22 = sshll.u32 %s817_s21, 4  ;;  %s132_s22 = int_to_ptr.vmem [resolvable:$true] %s131_s22 }
   0xe   : > { %s818_s24 = smov [#allocation7]   ;;  %s678_s26 = scalar_lea.vmem %s132_s22, 2048 }
   0xf   : > { %s1059_s20 = scalar_select %p887_p8, 1, 0 }
  0x10   : > { %p587_p9 = pneg %p887_p8  ;;  %s144_s25 = sshll.u32 %s818_s24, 4  ;;  %s145_s25 = int_to_ptr.vmem [resolvable:$true] %s144_s25 }
  0x11   : > { %p679_p13 = scmp.ne.s32.totalorder %s132_s22, %s678_s26  ;;  %p686_p5 = scmp.lt.s32.totalorder %s132_s22, %s132_s22 }
  0x12   : > { %p896_p11 = pnand %p587_p9, %p1053_p1  ;;  %p687_p7 = scmp.lt.s32.totalorder %s678_s26, %s678_s26 }
  0x14   : > { %p669_p12 = pneg %p896_p11  ;;  %p688_p10 = por %p687_p7, %p686_p5 }
  0x16   : > { %p681_p0 = pnand %p679_p13, %p669_p12 }
  0x18   : > { %p682_p3 = pneg %p681_p0 }
  0x1a   : > { %p689_p9 = pnand %p688_p10, %p682_p3 }
  0x1c   : > { %692 = shalt.err (!%p689_p9)
}
  0x1d   : > { %s819_s27 = smov 64   ;;  %s820_s28 = smov 4  }
  0x1e   : > { %590 = dma.hbm_to_vmem [thread:$0]  (!%p896_p11), %s1050_s1, 2048, %s132_s22, [#allocation6], %s819_s27, %s819_s27, %s820_s28  }
  0x1f   : > { %s704_s4 = scalar_lea.vmem %s145_s25, 256  ;;  %p712_p2 = scmp.lt.s32.totalorder %s145_s25, %s145_s25 }
  0x20   : > { %p705_p1 = scmp.ne.s32.totalorder %s145_s25, %s704_s4  ;;  %p713_p6 = scmp.lt.s32.totalorder %s704_s4, %s704_s4 }
  0x22   : > { %p707_p13 = pnand %p705_p1, %p669_p12  ;;  %p714_p5 = por %p713_p6, %p712_p2 }
  0x24   : > { %p708_p0 = pneg %p707_p13 }
  0x26   : > { %p715_p10 = pnand %p714_p5, %p708_p0 }
  0x28   : > { %718 = shalt.err (!%p715_p10)
}
  0x29   : > { %s821_s5 = smov 128   ;;  %s822_s6 = smov 8  }
  0x2a   : > { %593 = dma.hbm_to_vmem [thread:$0]  (!%p896_p11), %s1051_s2, 256, %s145_s25, [#allocation6], %s821_s5, %s821_s5, %s822_s6  }
  0x2b   : > { %s922_s9 = sadd.s32 1, %s815_s15   ;;  %s27_s11 = sadd.s32 1, %s811_s14 }
  0x2c   : > { %s24_s10 = ssub.s32 %s815_s15, %s922_s9  ;;  %p34_p2 = scmp.ne.s32.totalorder %s811_s14, %s807_s13 }
  0x2d   : > { %p25_p1 = scmp.eq.s32.totalorder %s24_s10, 0  ;;  %p35_p6 = scmp.eq.s32.totalorder %s815_s15, 0 }
  0x2e   : > { %p1061_p3 = scmp.eq.s32.totalorder %s868_s16, 1  ;;  %p604_p9 = scmp.lt.s32.totalorder %s815_s15, 2 }
  0x2f   : > { %s931_s17 = scalar_select %p25_p1, %s811_s14, %s27_s11  }
  0x30   : > { %p36_p12 = por %p35_p6, %p34_p2  ;;  %p935_p7 = por %p1061_p3, %p34_p2 }
  0x31   : > { %s158_s22 = sand.u32 1, %s811_s14   ;;  %s551_s24 = sshll.u32 %s815_s15, 8 }
  0x32   : > { %s1062_s21 = scalar_select %p935_p7, 1, 0 }
  0x33   : > { %s518_s23 = sshll.u32 %s158_s22, 4  ;;  %s945_s27 = scalar_lea.hbm %s1049_s0, %s551_s24 }
  0x34   : > { %s162_s28 = scalar_lea.vmem [#allocation2], %s518_s23  ;;  %p949_p11 = pnand %p604_p9, %p36_p12 }
  0x35   : > { %s170_s29 = sshll.u32 %s162_s28, 4  ;;  %s953_s4 = scalar_lea.sflag [#allocation3], %s158_s22  ;;  %s947_s29 = int_to_ptr.vmem [resolvable:$true] %s170_s29 }
  0x36   : > { %s719_s7 = scalar_lea.hbm %s945_s27, 256  ;;  %p721_p0 = pneg %p949_p11 }
  0x37   : > { %p720_p13 = scmp.ne.s32.totalorder %s945_s27, %s719_s7  ;;  %s724_s11 = scalar_lea.hbm %s1049_s0, 512 }
  0x38   : > { %p725_p1 = scmp.lt.s32.totalorder %s945_s27, %s1049_s0  ;;  %p726_p2 = scmp.lt.s32.totalorder %s724_s11, %s719_s7 }
  0x39   : > { %p722_p5 = pnand %p721_p0, %p720_p13 }
  0x3a   : > { %p727_p6 = por %p726_p2, %p725_p1 }
  0x3b   : > { %p723_p10 = pneg %p722_p5 }
  0x3d   : > { %p728_p12 = pnand %p727_p6, %p723_p10 }
  0x3f   : > { %731 = shalt.err (!%p728_p12)
}
  0x40   : > { %s732_s22 = scalar_lea.vmem %s947_s29, 256  ;;  %s823_s25 = smov [#allocation2]  }
  0x41   : > { %p733_p3 = scmp.ne.s32.totalorder %s947_s29, %s732_s22  ;;  %s737_s26 = sshll.u32 %s823_s25, 4  ;;  %s738_s26 = int_to_ptr.vmem [resolvable:$false] %s737_s26 }
  0x42   : > { %s739_s28 = scalar_lea.vmem %s738_s26, 512  ;;  %p740_p5 = scmp.lt.s32.totalorder %s947_s29, %s738_s26 }
  0x43   : > { %p735_p9 = pnand %p733_p3, %p721_p0  ;;  %p741_p7 = scmp.lt.s32.totalorder %s739_s28, %s732_s22 }
  0x45   : > { %p736_p13 = pneg %p735_p9  ;;  %p742_p4 = por %p741_p7, %p740_p5 }
  0x47   : > { %p743_p8 = pnand %p742_p4, %p736_p13 }
  0x49   : > { %746 = shalt.err (!%p743_p8)
}
  0x4a   : > { %597 = dma.hbm_to_vmem [thread:$0]  (!%p949_p11), %s945_s27, 256, %s947_s29, %s953_s4, %s821_s5, %s821_s5, %s822_s6  }
  0x4b   : > { %p1064_p0 = scmp.ne.s32.totalorder %s1059_s20, 0 }
  0x4c   : > { %s980_s7 = sand.u32 (!%p1064_p0), 1, %s807_s13   ;;  %p1065_p4 = scmp.ne.s32.totalorder (!%p1064_p0), %s1057_s18, 0 }
  0x4d   : > { %182 = sbr.rel (%p1064_p0) target bundleno = 336 (0x150), region = 32  ;;  %s523_s8 = sshll.u32 (!%p1064_p0), %s980_s7, 4 }
  0x4e   : > { %s185_s10 = scalar_lea.sflag (!%p1064_p0), [#allocation3], %s980_s7  ;;  %s986_s30 = scalar_lea.vmem (!%p1064_p0), [#allocation2], %s523_s8 }
  0x52   : > { %790 = dma.done.wait (%p1065_p4), %s185_s10, 256  }
  0x53   : > { %792 = vsyncadd (%p1065_p4), %s185_s10, 4294967040  ;;  %p1066_p8 = scmp.eq.s32.totalorder %s868_s16, 0 }
  0x55   : > { %794 = dma.done.wait (%p1066_p8), [#allocation6], 2304   ;;  %p1067_p7 = pmov %p1066_p8 }
  0x56   : > { %v648_v0 = vld [vmem:[#allocation5 + $0x78] sm:$0xff]   ;;  %v650_v2 = vld [vmem:[#allocation5 + $0x70] sm:$0xff]   ;;  %v652_v4 = vld [vmem:[#allocation5 + $0x68] sm:$0xff]   ;;  %s218_s18 = scalar_lea.vmem [#allocation8], %s523_s8  ;;  %s552_s5 = sshll.u32 %s868_s16, 8 }
  0x57   : > { %796 = vsyncadd (%p1067_p7), [#allocation6], 4294964992  ;;  %v649_v1 = vld [vmem:[#allocation5 + $0x38] sm:$0xff]   ;;  %553 = vmatprep.subr.bf16.mxu0 %v648_v0  ;;  %v651_v3 = vld [vmem:[#allocation5 + $0x30] sm:$0xff]   ;;  %s421_s20 = sshll.u32 %s218_s18, 4  ;;  %s1006_s29 = scalar_lea.hbm %s1052_s3, %s552_s5  ;;  %s1001_s20 = int_to_ptr.vmem [resolvable:$true] %s421_s20 }
  0x58   : > { %554 = vmatpush3.bf16.msra.mxu0 %v649_v1  ;;  %v653_v5 = vld [vmem:[#allocation5 + $0x28] sm:$0xff]   ;;  %v654_v6 = vld [vmem:[#allocation5 + $0x60] sm:$0xff]   ;;  %v656_v8 = vld [vmem:[#allocation5 + $0x58] sm:$0xff]   ;;  %s408_s4 = scalar_lea.sflag [#allocation4], %s980_s7  ;;  %s747_s11 = scalar_lea.vmem %s1001_s20, 256 }
  0x59   : > { %555 = vmatprep.subr.bf16.mxu0 %v650_v2  ;;  %v655_v7 = vld [vmem:[#allocation5 + $0x20] sm:$0xff]   ;;  %v657_v9 = vld [vmem:[#allocation5 + $0x18] sm:$0xff]   ;;  %v658_v10 = vld [vmem:[#allocation5 + $0x50] sm:$0xff]   ;;  %p748_p11 = scmp.ne.s32.totalorder %s1001_s20, %s747_s11  ;;  %p1068_p10 = scmp.ne.s32.totalorder %s1062_s21, 0 }
  0x5a   : > { %v666_v11 = vld [vmem:[%s986_s30 + $0x4] ss:$8 sps:$4 sm:$0xff]   ;;  %v664_v17 = vld [vmem:[%s986_s30] ss:$8 sps:$4 sm:$0xff]   ;;  %s824_s16 = smov [#allocation8]  }
  0x5b   : > { %v659_v12 = vld [vmem:[#allocation5 + $0x10] sm:$0xff]   ;;  %396 = vmatprep.mubr.bf16.mxu0 %v666_v11  ;;  %v660_v13 = vld [vmem:[#allocation5 + $0x48] sm:$0xff]   ;;  %v662_v15 = vld [vmem:[#allocation5 + $0x40] sm:$0xff]   ;;  %p749_p1 = pnand %p748_p11, %p1068_p10  ;;  %s751_s23 = sshll.u32 %s824_s16, 4  ;;  %s752_s23 = int_to_ptr.vmem [resolvable:$false] %s751_s23 }
  0x5c   : > { %556 = vmatpush3.bf16.msra.mxu0 %v651_v3  ;;  %v661_v14 = vld [vmem:[#allocation5 + $0x8] sm:$0xff]   ;;  %v663_v16 = vld [vmem:[#allocation5] sm:$0xff]   ;;  %s753_s24 = scalar_lea.vmem %s752_s23, 512  ;;  %p754_p6 = scmp.lt.s32.totalorder %s1001_s20, %s752_s23 }
  0x5d   : > { %557 = vmatprep.subr.bf16.mxu0 %v652_v4  ;;  %v256_v19 = vld [vmem:[#allocation7] sm:$0xff]  ;;  %v257_v24 = vld [vmem:[#allocation7 + $0x8] sm:$0xff]  ;;  %p750_p2 = pneg %p749_p1  ;;  %p755_p12 = scmp.lt.s32.totalorder %s753_s24, %s747_s11 }
  0x5f   : > { %p756_p3 = por %p755_p12, %p754_p6 }
  0x60   : > { %558 = vmatpush3.bf16.msra.mxu0 %v653_v5 }
  0x61   : > { %559 = vmatprep.subr.bf16.mxu0 %v654_v6  ;;  %p757_p9 = pnand %p756_p3, %p750_p2 }
  0x64   : > { %560 = vmatpush3.bf16.msra.mxu0 %v655_v7 }
  0x65   : > { %561 = vmatprep.subr.bf16.mxu0 %v656_v8 }
  0x68   : > { %562 = vmatpush3.bf16.msra.mxu0 %v657_v9 }
  0x69   : > { %563 = vmatprep.subr.bf16.mxu0 %v658_v10 }
  0x6c   : > { %564 = vmatpush3.bf16.msra.mxu0 %v659_v12 }
  0x6d   : > { %565 = vmatprep.subr.bf16.mxu0 %v660_v13 }
  0x70   : > { %566 = vmatpush3.bf16.msra.mxu0 %v661_v14 }
  0x71   : > { %567 = vmatprep.subr.bf16.mxu0 %v662_v15 }
  0x74   : > { %568 = vmatpush3.bf16.msra.mxu0 %v663_v16 }
  0x77   : > { %397 = vmatmul.mubr.bf16.vlgmr.msra.gmra.mxu0 %v664_v17 }
 0x137   : > { %v569_v18 = vpop.f32.mrf.mxu0 }
 0x139   : > { %v570_v20 = vpop.f32.mrf.mxu0 }
 0x13a   : > { %v571_v21 = vadd.f32 %v570_v20, %v569_v18 }
 0x13b   : > { %v572_v22 = vpop.f32.mrf.mxu0 }
 0x13c   : > { %v399_v23 = vadd.f32 %v571_v21, %v256_v19 }
 0x13d   : > { %v573_v25 = vpop.f32.mrf.mxu0 }
 0x13e   : > { %405 = vst [vmem:[%s218_s18] sm:$0xff] %v399_v23  ;;  %v574_v26 = vadd.f32 %v573_v25, %v572_v22 }
 0x140   : > { %v402_v27 = vadd.f32 %v574_v26, %v257_v24 }
 0x142   : > { %406 = vst [vmem:[%s218_s18 + $0x8] sm:$0xff] %v402_v27 }
 0x143   : > { %760 = shalt.err (!%p757_p9)
}
 0x144   : > { %s761_s22 = scalar_lea.hbm %s1006_s29, 256  ;;  %s765_s28 = scalar_lea.hbm %s1052_s3, 512 }
 0x145   : > { %p762_p13 = scmp.ne.s32.totalorder %s1006_s29, %s761_s22  ;;  %p766_p4 = scmp.lt.s32.totalorder %s1006_s29, %s1052_s3 }
 0x146   : > { %p767_p8 = scmp.lt.s32.totalorder %s765_s28, %s761_s22 }
 0x147   : > { %p763_p5 = pnand %p762_p13, %p1068_p10 }
 0x148   : > { %p768_p7 = por %p767_p8, %p766_p4 }
 0x149   : > { %p764_p0 = pneg %p763_p5 }
 0x14b   : > { %p769_p11 = pnand %p768_p7, %p764_p0 }
 0x14d   : > { %772 = shalt.err (!%p769_p11)
}
 0x14e   : > { %s825_s30 = smov 128   ;;  %s826_s18 = smov 8  }
 0x14f   : > { %585 = dma.vmem_to_hbm [thread:$0]  (%p1068_p10), %s1001_s20, 256, %s1006_s29, %s408_s4, %s825_s30, %s825_s30, %s826_s18  }
 0x150 PF: > { %s436_s5 = sand.u32 1, %s803_s12   ;;  %p1069_p1 = scmp.ne.s32.totalorder %s1058_s19, 0 }
 0x151   : > { %p1070_p2 = scmp.ge.s32.totalorder %s815_s15, 2  ;;  %s437_s6 = scalar_lea.sflag [#allocation4], %s436_s5 }
 0x153   : > { %p599_p6 = pnand %p1070_p2, %p1069_p1 }
 0x155   : > { %p600_p12 = pneg %p599_p6 }
 0x157   : > { %798 = dma.done.wait (%p600_p12), %s437_s6, 256  }
 0x158   : > { %800 = vsyncadd (%p600_p12), %s437_s6, 4294967040  ;;  %p17_p3 = scmp.ge.s32.totalorder %s922_s9, 4   ;;  %s1071_s12 = smov %s807_s13 }
 0x159   : > { %s1072_s13 = smov %s811_s14  ;;  %s1073_s14 = smov %s931_s17 }
 0x15a   : > { %s1074_s15 = smov %s922_s9  ;;  %19 = sbr.rel (!%p17_p3) target bundleno = 6 (0x6), region = 85 }
 0x15f   :  { %442 = vsyncpa [#allocation3], 1 }
 0x160   :  { %444 = vsyncpa [#allocation3 + $0x1], 1 }
 0x161   :  { %445 = vsyncpa [#allocation6], 1 }
 0x162   :  { %446 = vsyncpa [#allocation4], 1 }
 0x163   :  { %448 = vsyncpa [#allocation4 + $0x1], 1 }

</bundles_post_ra>
